<compile_context>
chip_gen: v5e
topology: v5e:2x2
jax: 0.10.0
libtpu: 0.0.40
codegen_flags: <defaults>
</compile_context>

<pallas_src>
import functools

import jax
import jax.numpy as jnp
from jax import lax
from jax.experimental import pallas as pl
from jax.experimental.pallas import tpu as pltpu

_LANES = 128      # vreg lane count (last dim)
_SUBLANES = 8     # f32 sublane count (second-to-last dim)


def _choose_row_split(batch, flat_cols):
    """Pick S (sub-rows per batch row) so the reshaped (batch*S, flat_cols//S) view
    has rows % 8 == 0 (full sublane occupancy) and lane-aligned (x128) columns."""
    if batch % _SUBLANES == 0 or flat_cols % _LANES != 0:
        return 1
    q = flat_cols // _LANES          # S must divide q so the columns stay x128
    best_ge8 = None
    for s in range(1, q + 1):
        if q % s:
            continue
        if (batch * s) % _SUBLANES == 0:
            return s                 # smallest S giving a multiple-of-8 row count
        if best_ge8 is None and batch * s >= _SUBLANES:
            best_ge8 = s
    if best_ge8 is not None:
        return best_ge8              # >= 8 rows (last sublane group partly filled)
    return q                         # tiny input: best occupancy available


def _masked_mse_kernel(info_ref, thresh_ref, x_ref, y_ref, out_ref, acc_ref, *,
                       block_cols, num_row_blocks, lane_aligned):
    """Grid = (row_blocks ["parallel"], col_blocks ["arbitrary"]).

    info_ref   : (3*NRB,) int32 SMEM  -- [needed_col_blocks | min_thresh | max_thresh]
    thresh_ref : (BR, 1)  int32 VMEM  -- per-row local-column mask threshold
    x_ref/y_ref: (BR, BC)             -- input / target tile of the (R, C) flat view
    out_ref    : (1, 8, 128) f32 VMEM -- per-row-block partial sums (lane-dense slab)
    acc_ref    : (BR, BC) f32 VMEM scratch -- elementwise running accumulator
    """
    r = pl.program_id(0)
    t = pl.program_id(1)

    @pl.when(t == 0)
    def _():
        acc_ref[...] = jnp.zeros_like(acc_ref)

    min_th = info_ref[num_row_blocks + r]
    max_th = info_ref[2 * num_row_blocks + r]
    col0 = t * block_cols

    @pl.when(col0 < max_th)                  # else: fully-masked tail tile -> no compute
    def _():
        diff = x_ref[...].astype(jnp.float32) - y_ref[...].astype(jnp.float32)
        sq = diff * diff

        @pl.when(col0 + block_cols <= min_th)        # fully-valid interior tile
        def _():
            acc_ref[...] += sq

        @pl.when(col0 + block_cols > min_th)         # boundary tile: mask columns
        def _():
            local_th = thresh_ref[...] - col0                      # (BR, 1) int32
            lane = lax.broadcasted_iota(jnp.int32, sq.shape, 1)    # (BR, BC)
            acc_ref[...] += jnp.where(lane < local_th, sq, 0.0)

    @pl.when(t == pl.num_programs(1) - 1)
    def _():
        a = acc_ref[...]
        if lane_aligned:
            # Fold lane groups with pure VALU adds -> lane-dense (8, 128) partial slab.
            red = a.reshape(_SUBLANES, block_cols // _LANES, _LANES).sum(axis=1)
            out_ref[...] = red.reshape(1, _SUBLANES, _LANES)
        else:
            total = jnp.sum(a)
            sub = lax.broadcasted_iota(jnp.int32, (1, _SUBLANES, _LANES), 1)
            lane = lax.broadcasted_iota(jnp.int32, (1, _SUBLANES, _LANES), 2)
            out_ref[...] = jnp.where((sub == 0) & (lane == 0), total, 0.0)


def masked_mse_loss(inp, tgt, lengths, *, block_cols=None):
    """Pallas TPU implementation of MaskedMSELoss.forward(input, target, lengths)."""
    assert inp.shape == tgt.shape and inp.ndim == 3
    B, T, D = inp.shape
    TD = T * D
    assert TD < 2 ** 31, "int32 flat-column indexing would overflow"
    itemsize = jnp.dtype(inp.dtype).itemsize

    # ---- layout: (B, T, D) -> (R, C) lane-dense, sublane-full rows ----
    S = _choose_row_split(B, TD)
    R, C = B * S, TD // S
    BR = _SUBLANES if R % _SUBLANES == 0 else R
    NRB = R // BR

    if block_cols is None:
        target_bytes = 2 << 20       # ~2 MiB per input tile (>=85% of HBM roofline)
        block_cols = max(_LANES, (target_bytes // (BR * itemsize)) // _LANES * _LANES)
    if block_cols >= C:
        block_cols = C
    else:
        assert block_cols % _LANES == 0, "block_cols must be a multiple of 128 (or >= cols)"
    NCB = pl.cdiv(C, block_cols)

    x2 = inp.reshape(R, C)           # free, contiguous reshapes
    y2 = tgt.reshape(R, C)

    # ---- per-row mask thresholds (local column coordinates) ----
    lengths_i = jnp.clip(jnp.asarray(lengths).astype(jnp.int32), 0, T)     # (B,)
    flat_thresh = lengths_i * D                                            # (B,)
    row_off = jnp.arange(S, dtype=jnp.int32) * C                           # (S,)
    row_thresh = jnp.clip(flat_thresh[:, None] - row_off[None, :], 0, C)
    row_thresh = row_thresh.reshape(R, 1).astype(jnp.int32)

    # ---- per-row-block scalars (prefetched to SMEM) ----
    rb = row_thresh.reshape(NRB, BR)
    max_th = rb.max(axis=1)
    min_th = rb.min(axis=1)
    nblk = jnp.maximum((max_th + block_cols - 1) // block_cols, 1)   # >=1 for index clamp
    info = jnp.concatenate([nblk, min_th, max_th]).astype(jnp.int32)  # (3*NRB,)

    def xy_index_map(r, t, info_sref):
        # Clamp to the last needed column block: repeated block indices skip the HBM
        # re-fetch of fully-masked tail tiles; their (stale) data is compute-skipped.
        return (r, jnp.minimum(t, info_sref[r] - 1))

    lane_aligned = (BR == _SUBLANES) and (block_cols % _LANES == 0)
    kernel = functools.partial(_masked_mse_kernel, block_cols=block_cols,
                               num_row_blocks=NRB, lane_aligned=lane_aligned)

    # VMEM budget derived from actual footprint (safe on v7x's 64 MiB per core).
    tile_bytes = BR * block_cols * itemsize
    acc_bytes = BR * block_cols * 4
    footprint = 2 * 2 * tile_bytes + acc_bytes + 2 * R * 4 + 2 * _SUBLANES * _LANES * 4
    vmem_limit = int(min(max(footprint * 3 // 2 + (1 << 20), 16 << 20), 64 << 20))

    partials = pl.pallas_call(
        kernel,
        out_shape=jax.ShapeDtypeStruct((NRB, _SUBLANES, _LANES), jnp.float32),
        grid_spec=pltpu.PrefetchScalarGridSpec(
            num_scalar_prefetch=1,
            grid=(NRB, NCB),
            in_specs=[
                pl.BlockSpec((BR, 1), lambda r, t, info_sref: (r, 0)),   # thresholds
                pl.BlockSpec((BR, block_cols), xy_index_map),            # input tile
                pl.BlockSpec((BR, block_cols), xy_index_map),            # target tile
            ],
            out_specs=pl.BlockSpec((1, _SUBLANES, _LANES),
                                   lambda r, t, info_sref: (r, 0, 0)),
            scratch_shapes=[pltpu.VMEM((BR, block_cols), jnp.float32)],
        ),
        compiler_params=pltpu.CompilerParams(
            dimension_semantics=("parallel", "arbitrary"),
            vmem_limit_bytes=vmem_limit,
        ),
    )(info, row_thresh, x2, y2)

    # Analytic denominator: mask.sum() == sum(clip(lengths, 0, T)).
    denom = jnp.sum(lengths_i).astype(jnp.float32)
    return jnp.sum(partials) / denom


def masked_mse_ref(inp, tgt, lengths):
    """Pure-JAX reference matching the PyTorch module exactly."""
    B, T, D = inp.shape
    mask = (jnp.arange(T)[None, :] < lengths[:, None]).astype(jnp.float32)  # (B, T)
    mask3 = mask[:, :, None]
    loss = jnp.sum((inp * mask3 - tgt * mask3) ** 2)
    return loss / jnp.sum(mask)


if __name__ == "__main__":
    key = jax.random.PRNGKey(0)

    cases = [
        # (B, T, D, lengths, block_cols)
        (2, 64, 32, [60, 55], None),           # default tiling: single column block
        (2, 64, 32, [60, 55], 128),            # multi-block: interior + boundary paths
        (2, 64, 32, [9, 5], 128),              # short lengths: boundary + tail-DMA skip
        (16, 16, 32, list(range(16)), 128),    # two row blocks (parallel axis), ragged
        (2, 8, 8, [5, 3], None),               # tiny/unaligned fallback layout
    ]
    for idx, (B, T, D, lens, bc) in enumerate(cases):
        k1, k2 = jax.random.split(jax.random.fold_in(key, idx))
        inp = jax.random.normal(k1, (B, T, D), dtype=jnp.float32)
        tgt = jax.random.normal(k2, (B, T, D), dtype=jnp.float32)
        lengths = jnp.array(lens, dtype=jnp.int32)

        loss = jax.block_until_ready(masked_mse_loss(inp, tgt, lengths, block_cols=bc))
        ref = masked_mse_ref(inp, tgt, lengths)
        assert jnp.allclose(loss, ref, rtol=1e-4, atol=1e-5), (idx, loss, ref)

    print("KERNEL_OK")
</pallas_src>

<mosaic_0001>
module attributes {stable_mosaic.version = 11 : i64} {
  func.func @_masked_mse_kernel(%arg0: i32, %arg1: i32, %arg2: memref<3xi32, #tpu.memory_space<smem>>, %arg3: memref<8x1xi32, #tpu.memory_space<vmem>>, %arg4: memref<8x512xf32, #tpu.memory_space<vmem>>, %arg5: memref<8x512xf32, #tpu.memory_space<vmem>>, %arg6: memref<1x8x128xf32, #tpu.memory_space<vmem>>, %arg7: memref<8x512xf32, #tpu.memory_space<vmem>>) attributes {dimension_semantics = [#tpu.dimension_semantics<parallel>, #tpu.dimension_semantics<arbitrary>], iteration_bounds = array<i64: 1, 1>, scalar_prefetch = 1 : i64, scratch_operands = 1 : i64, tpu.core_type = #tpu.core_type<tc>, window_params = [{transform_indices = @transform_0, window_bounds = array<i64: 8, 1>}, {transform_indices = @transform_1, window_bounds = array<i64: 8, 512>}, {transform_indices = @transform_2, window_bounds = array<i64: 8, 512>}, {transform_indices = @transform_3, window_bounds = array<i64: 1, 8, 128>}]} {
    %c0_i32 = arith.constant 0 : i32
    %0 = arith.cmpi eq, %arg1, %c0_i32 : i32
    %1 = arith.extui %0 : i1 to i32
    %c0_i32_0 = arith.constant 0 : i32
    %2 = arith.cmpi ne, %1, %c0_i32_0 : i32
    scf.if %2 {
      %cst = arith.constant 0.000000e+00 : f32
      %16 = vector.broadcast %cst : f32 to vector<8x512xf32>
      %c0 = arith.constant 0 : index
      %c0_4 = arith.constant 0 : index
      %17 = vector.load %arg7[%c0, %c0_4] : memref<8x512xf32, #tpu.memory_space<vmem>>, vector<8x512xf32>
      tpu.vector_store %arg7[%c0, %c0_4], %16 {strides = array<i32>} : memref<8x512xf32, #tpu.memory_space<vmem>>, vector<8x512xf32>,
    } else {
    }
    %c1_i32 = arith.constant 1 : i32
    %3 = arith.addi %c1_i32, %arg0 : i32
    %4 = arith.index_cast %3 : i32 to index
    %5 = memref.load %arg2[%4] : memref<3xi32, #tpu.memory_space<smem>>
    %c2_i32 = arith.constant 2 : i32
    %6 = arith.addi %c2_i32, %arg0 : i32
    %7 = arith.index_cast %6 : i32 to index
    %8 = memref.load %arg2[%7] : memref<3xi32, #tpu.memory_space<smem>>
    %c512_i32 = arith.constant 512 : i32
    %9 = arith.muli %arg1, %c512_i32 : i32
    %10 = arith.cmpi slt, %9, %8 : i32
    %11 = arith.extui %10 : i1 to i32
    %c0_i32_1 = arith.constant 0 : i32
    %12 = arith.cmpi ne, %11, %c0_i32_1 : i32
    scf.if %12 {
      %c0 = arith.constant 0 : index
      %c0_4 = arith.constant 0 : index
      %16 = vector.load %arg4[%c0, %c0_4] : memref<8x512xf32, #tpu.memory_space<vmem>>, vector<8x512xf32>
      %c0_5 = arith.constant 0 : index
      %c0_6 = arith.constant 0 : index
      %17 = vector.load %arg5[%c0_5, %c0_6] : memref<8x512xf32, #tpu.memory_space<vmem>>, vector<8x512xf32>
      %18 = arith.subf %16, %17 : vector<8x512xf32>
      %19 = arith.mulf %18, %18 : vector<8x512xf32>
      %c512_i32_7 = arith.constant 512 : i32
      %20 = arith.addi %9, %c512_i32_7 : i32
      %21 = arith.cmpi sle, %20, %5 : i32
      %22 = arith.extui %21 : i1 to i32
      %c0_i32_8 = arith.constant 0 : i32
      %23 = arith.cmpi ne, %22, %c0_i32_8 : i32
      scf.if %23 {
        %c0_11 = arith.constant 0 : index
        %c0_12 = arith.constant 0 : index
        %28 = vector.load %arg7[%c0_11, %c0_12] : memref<8x512xf32, #tpu.memory_space<vmem>>, vector<8x512xf32>
        %29 = arith.addf %28, %19 : vector<8x512xf32>
        %c0_13 = arith.constant 0 : index
        %c0_14 = arith.constant 0 : index
        %30 = vector.load %arg7[%c0_13, %c0_14] : memref<8x512xf32, #tpu.memory_space<vmem>>, vector<8x512xf32>
        tpu.vector_store %arg7[%c0_13, %c0_14], %29 {strides = array<i32>} : memref<8x512xf32, #tpu.memory_space<vmem>>, vector<8x512xf32>,
      } else {
      }
      %c512_i32_9 = arith.constant 512 : i32
      %24 = arith.addi %9, %c512_i32_9 : i32
      %25 = arith.cmpi sgt, %24, %5 : i32
      %26 = arith.extui %25 : i1 to i32
      %c0_i32_10 = arith.constant 0 : i32
      %27 = arith.cmpi ne, %26, %c0_i32_10 : i32
      scf.if %27 {
        %c0_11 = arith.constant 0 : index
        %c0_12 = arith.constant 0 : index
        %28 = vector.load %arg3[%c0_11, %c0_12] : memref<8x1xi32, #tpu.memory_space<vmem>>, vector<8x1xi32>
        %29 = vector.broadcast %9 : i32 to vector<8x1xi32>
        %30 = arith.subi %28, %29 : vector<8x1xi32>
        %31 = tpu.iota {dimensions = array<i32: 1>} : vector<8x512xi32>
        %c0_13 = arith.constant 0 : index
        %c0_14 = arith.constant 0 : index
        %32 = vector.load %arg7[%c0_13, %c0_14] : memref<8x512xf32, #tpu.memory_space<vmem>>, vector<8x512xf32>
        %33 = vector.broadcast %30 : vector<8x1xi32> to vector<8x512xi32>
        %34 = arith.cmpi slt, %31, %33 : vector<8x512xi32>
        %cst = arith.constant 0.000000e+00 : f32
        %35 = vector.broadcast %cst : f32 to vector<8x512xf32>
        %36 = arith.select %34, %19, %35 : vector<8x512xi1>, vector<8x512xf32>
        %37 = arith.addf %32, %36 : vector<8x512xf32>
        %c0_15 = arith.constant 0 : index
        %c0_16 = arith.constant 0 : index
        %38 = vector.load %arg7[%c0_15, %c0_16] : memref<8x512xf32, #tpu.memory_space<vmem>>, vector<8x512xf32>
        tpu.vector_store %arg7[%c0_15, %c0_16], %37 {strides = array<i32>} : memref<8x512xf32, #tpu.memory_space<vmem>>, vector<8x512xf32>,
      } else {
      }
    } else {
    }
    %c0_i32_2 = arith.constant 0 : i32
    %13 = arith.cmpi eq, %arg1, %c0_i32_2 : i32
    %14 = arith.extui %13 : i1 to i32
    %c0_i32_3 = arith.constant 0 : i32
    %15 = arith.cmpi ne, %14, %c0_i32_3 : i32
    scf.if %15 {
      %c0 = arith.constant 0 : index
      %c0_4 = arith.constant 0 : index
      %16 = vector.load %arg7[%c0, %c0_4] : memref<8x512xf32, #tpu.memory_space<vmem>>, vector<8x512xf32>
      %17 = vector.shape_cast %16 : vector<8x512xf32> to vector<8x4x128xf32>
      %cst = arith.constant dense<0.000000e+00> : vector<8x128xf32>
      %18 = vector.multi_reduction <add>, %17, %cst [1] : vector<8x4x128xf32> to vector<8x128xf32>
      %19 = vector.shape_cast %18 : vector<8x128xf32> to vector<1x8x128xf32>
      %c0_5 = arith.constant 0 : index
      %c0_6 = arith.constant 0 : index
      %c0_7 = arith.constant 0 : index
      %20 = vector.load %arg6[%c0_5, %c0_6, %c0_7] : memref<1x8x128xf32, #tpu.memory_space<vmem>>, vector<1x8x128xf32>
      tpu.vector_store %arg6[%c0_5, %c0_6, %c0_7], %19 {strides = array<i32>} : memref<1x8x128xf32, #tpu.memory_space<vmem>>, vector<1x8x128xf32>,
    } else {
    }
    return
  }
  func.func @transform_0(%arg0: i32, %arg1: i32, %arg2: memref<3xi32, #tpu.memory_space<smem>>) -> (i32, i32) {
    %c0_i32 = arith.constant 0 : i32
    %c0_i32_0 = arith.constant 0 : i32
    return %arg0, %c0_i32 : i32, i32
  }
  func.func @transform_1(%arg0: i32, %arg1: i32, %arg2: memref<3xi32, #tpu.memory_space<smem>>) -> (i32, i32) {
    %0 = arith.index_cast %arg0 : i32 to index
    %1 = memref.load %arg2[%0] : memref<3xi32, #tpu.memory_space<smem>>
    %c1_i32 = arith.constant 1 : i32
    %2 = arith.subi %1, %c1_i32 : i32
    %3 = arith.minsi %arg1, %2 : i32
    %c0_i32 = arith.constant 0 : i32
    return %arg0, %3 : i32, i32
  }
  func.func @transform_2(%arg0: i32, %arg1: i32, %arg2: memref<3xi32, #tpu.memory_space<smem>>) -> (i32, i32) {
    %0 = arith.index_cast %arg0 : i32 to index
    %1 = memref.load %arg2[%0] : memref<3xi32, #tpu.memory_space<smem>>
    %c1_i32 = arith.constant 1 : i32
    %2 = arith.subi %1, %c1_i32 : i32
    %3 = arith.minsi %arg1, %2 : i32
    %c0_i32 = arith.constant 0 : i32
    return %arg0, %3 : i32, i32
  }
  func.func @transform_3(%arg0: i32, %arg1: i32, %arg2: memref<3xi32, #tpu.memory_space<smem>>) -> (i32, i32, i32) {
    %c0_i32 = arith.constant 0 : i32
    %c0_i32_0 = arith.constant 0 : i32
    %c0_i32_1 = arith.constant 0 : i32
    return %arg0, %c0_i32, %c0_i32_0 : i32, i32, i32
  }
}

</mosaic_0001>

<bundles_post_ra>
// kernel: tpu_custom_call.1
= control target key start
LH: loop header
LB: loop body
LE: loop exit
PB: predicated region body
PF: predicated region fallthrough
CT: control target
= control target key end

     0   :  { %s447_s18 = smov [#allocation4]   ;;  %s535_s0 = inlined_call_operand.vmem [shape: s32[3], index: 0, kind: input, shape index: {}]   ;;  %s536_s1 = inlined_call_operand.vmem [shape: s32[8,1], index: 1, kind: input, shape index: {}]   ;;  %s537_s2 = inlined_call_operand.hbm [shape: f32[8,512], index: 2, kind: input, shape index: {}]   ;;  %s538_s3 = inlined_call_operand.hbm [shape: f32[8,512], index: 3, kind: input, shape index: {}]   ;;  %s539_s4 = inlined_call_operand.hbm [shape: f32[1,8,128], index: 4, kind: output, shape index: {}]  }
   0x1   :  { %s10_s17 = sshll.u32 %s535_s0, 4  ;;  %s11_s17 = int_to_ptr.vmem [resolvable:$true] %s10_s17 }
   0x2   :  { %13 = dma.vmem_to_smem %s11_s17, 16, %s447_s18, [#allocation3] }
   0x3   :  { %439 = dma.done.wait [#allocation3], 16 }
   0x4   :  { %440 = vsyncadd [#allocation3], 4294967280 }
   0x5   :  { %16 = sfence }
   0x6   :  { %17 = vsyncpa [#allocation6], 0 }
   0x7   :  { %18 = vsyncpa [#allocation9], 0 }
   0x8   :  { %19 = vsyncpa [#allocation7], 0  ;;  %s24_s19 = sld [smem:[#allocation4]]  ;;  %s448_s21 = smov [#allocation5]  }
   0x9   :  { %s36_s22 = sshll.u32 %s448_s21, 4  ;;  %s449_s23 = smov [#allocation8]   ;;  %s37_s22 = int_to_ptr.vmem [resolvable:$true] %s36_s22 }
   0xa   :  { %s483_s24 = sshll.u32 %s449_s23, 4  ;;  %s371_s11 = scalar_lea.hbm %s537_s2, 32  ;;  %s55_s24 = int_to_ptr.vmem [resolvable:$true] %s483_s24 }
   0xe   :  { %s328_s20 = sadd.s32 4294967295, %s24_s19 }
   0xf   :  { %p329_p0 = scmp.gt.s32.totalorder %s328_s20, 0 }
  0x11   :  { %s541_s20 = smov (%p329_p0, %s328_s20), 0 }
  0x12   :  { %s344_s0 = sshll.u32 %s541_s20, 5 }
  0x13   :  { %s32_s27 = scalar_lea.hbm %s537_s2, %s344_s0  ;;  %s50_s30 = scalar_lea.hbm %s538_s3, %s344_s0 }
  0x14   :  { %s34_s5 = sshll.u32 %s32_s27, 4  ;;  %s52_s6 = sshll.u32 %s50_s30, 4  ;;  %s35_s5 = int_to_ptr.hbm [resolvable:$true] %s34_s5  ;;  %s53_s6 = int_to_ptr.hbm [resolvable:$true] %s52_s6 }
  0x15   :  { %s367_s7 = sshra.s32 %s35_s5, 4  ;;  %s368_s7 = int_to_ptr.hbm [resolvable:$true] %s367_s7 }
  0x16   :  { %s369_s8 = scalar_lea.hbm %s368_s7, 32  ;;  %p372_p2 = scmp.lt.s32.totalorder %s368_s7, %s537_s2 }
  0x17   :  { %p370_p1 = scmp.ne.s32.totalorder %s368_s7, %s369_s8  ;;  %p373_p3 = scmp.lt.s32.totalorder %s371_s11, %s369_s8 }
  0x19   :  { %p374_p4 = por %p373_p3, %p372_p2 }
  0x1b   :  { %p375_p5 = pnand %p374_p4, %p370_p1 }
  0x1d   :  { %378 = shalt.err (!%p375_p5)
}
  0x1e   :  { %39 = dma.hbm_to_vmem [thread:$0]  %s35_s5, 512, %s37_s22, [#allocation6]  }
  0x1f   :  { %s391_s14 = sshra.s32 %s53_s6, 4  ;;  %s395_s18 = scalar_lea.hbm %s538_s3, 32  ;;  %s392_s14 = int_to_ptr.hbm [resolvable:$true] %s391_s14 }
  0x20   :  { %s393_s15 = scalar_lea.hbm %s392_s14, 32  ;;  %p396_p7 = scmp.lt.s32.totalorder %s392_s14, %s538_s3 }
  0x21   :  { %p394_p6 = scmp.ne.s32.totalorder %s392_s14, %s393_s15  ;;  %p397_p8 = scmp.lt.s32.totalorder %s395_s18, %s393_s15 }
  0x23   :  { %p398_p9 = por %p397_p8, %p396_p7 }
  0x25   :  { %p399_p10 = pnand %p398_p9, %p394_p6 }
  0x27   :  { %402 = shalt.err (!%p399_p10)
}
  0x28   :  { %57 = dma.hbm_to_vmem [thread:$0]  %s53_s6, 512, %s55_s24, [#allocation9]  }
  0x29   :  { %441 = dma.done.wait [#allocation6], 512  }
  0x2a   :  { %442 = vsyncadd [#allocation6], 4294966784 }
  0x2b   :  { %443 = dma.done.wait [#allocation9], 512  }
  0x2c   :  { %444 = vsyncadd [#allocation9], 4294966784  ;;  %s504_s2 = sld [smem:[#allocation4 + $0x1]]  ;;  %v450_v0 = vmov 0.0  }
  0x2d   :  { %80 = vst [vmem:[#allocation2 + $0x10] sm:$0xff] %v450_v0  ;;  %s337_s21 = sld [smem:[#allocation4 + $0x2]] }
  0x2e   :  { %81 = vst [vmem:[#allocation2] sm:$0xff] %v450_v0 }
  0x2f   :  { %82 = vst [vmem:[#allocation2 + $0x18] sm:$0xff] %v450_v0 }
  0x30   :  { %83 = vst [vmem:[#allocation2 + $0x8] sm:$0xff] %v450_v0 }
  0x33   :  { %p339_p11 = scmp.le.s32.totalorder %s337_s21, 0 }
  0x34   :  { %p341_p12 = scmp.lt.s32.totalorder (!%p339_p11), %s504_s2, 512 }
  0x35   :  { %92 = sbr.rel (%p339_p11) target bundleno = 203 (0xcb), region = 29 }
  0x3a   :  { %v93_v1 = vld [vmem:[#allocation5] sm:$0xff]  ;;  %v94_v2 = vld [vmem:[#allocation5 + $0x8] sm:$0xff]  ;;  %v95_v3 = vld [vmem:[#allocation5 + $0x10] sm:$0xff] }
  0x3b   :  { %v96_v4 = vld [vmem:[#allocation5 + $0x18] sm:$0xff]  ;;  %v97_v5 = vld [vmem:[#allocation8] sm:$0xff]  ;;  %v98_v6 = vld [vmem:[#allocation8 + $0x8] sm:$0xff]  ;;  %113 = sbr.rel (%p341_p12) target bundleno = 71 (0x47), region = 33 }
  0x3c   :  { %v99_v7 = vld [vmem:[#allocation8 + $0x10] sm:$0xff]  ;;  %v100_v8 = vld [vmem:[#allocation8 + $0x18] sm:$0xff]  ;;  %v101_v9 = vsub.f32 %v93_v1, %v97_v5  ;;  %v102_v10 = vsub.f32 %v94_v2, %v98_v6 }
  0x3d   :  { %v103_v11 = vsub.f32 %v95_v3, %v99_v7  ;;  %v104_v12 = vsub.f32 %v96_v4, %v100_v8 }
  0x3e   :  { %v105_v13 = vmul.f32 %v101_v9, %v101_v9  ;;  %v106_v14 = vmul.f32 %v102_v10, %v102_v10 }
  0x3f   :  { %v107_v15 = vmul.f32 %v103_v11, %v103_v11  ;;  %v108_v16 = vmul.f32 %v104_v12, %v104_v12 }
  0x40   :  { %v114_v17 = vld [vmem:[#allocation2 + $0x10] sm:$0xff]  ;;  %v115_v18 = vld [vmem:[#allocation2] sm:$0xff]  ;;  %v116_v19 = vld [vmem:[#allocation2 + $0x18] sm:$0xff] }
  0x41   :  { %v118_v20 = vadd.f32 %v114_v17, %v105_v13  ;;  %v119_v21 = vadd.f32 %v115_v18, %v106_v14  ;;  %v120_v22 = vadd.f32 %v116_v19, %v107_v15  ;;  %v117_v23 = vld [vmem:[#allocation2 + $0x8] sm:$0xff] }
  0x42   :  { %v121_v24 = vadd.f32 %v117_v23, %v108_v16 }
  0x43   :  { %122 = vst [vmem:[#allocation2 + $0x10] sm:$0xff] %v118_v20 }
  0x44   :  { %123 = vst [vmem:[#allocation2] sm:$0xff] %v119_v21 }
  0x45   :  { %124 = vst [vmem:[#allocation2 + $0x18] sm:$0xff] %v120_v22 }
  0x46   :  { %125 = vst [vmem:[#allocation2 + $0x8] sm:$0xff] %v121_v24 }
  0x47 PF:  { %p343_p13 = scmp.ge.s32.totalorder %s504_s2, 512 }
  0x49   :  { %129 = sbr.rel (%p343_p13) target bundleno = 203 (0xcb), region = 37 }
  0x4e   :  { %v130_v25 = vld [vmem:[%s536_s1] sm:$0xff]  ;;  %v451_v26 = vmov 0   ;;  %v133_v27 = vlaneseq  ;;  %v138_v32 = vld [vmem:[#allocation2 + $0x10] sm:$0xff]  ;;  %v140_v34 = vld [vmem:[#allocation2 + $0x18] sm:$0xff] }
  0x4f   :  { %354 = vset.pattern.permute.xlu0 %v451_v26  ;;  %v139_v33 = vld [vmem:[#allocation2] sm:$0xff]  ;;  %v141_v36 = vld [vmem:[#allocation2 + $0x8] sm:$0xff] }
  0x50   :  { %143 = vperm.xlu0 %354, %v130_v25   ;;  %v134_v28 = vand.u32 127, %v133_v27 }
  0x52   :  { %v135_v29 = vadd.s32 128, %v134_v28  ;;  %v136_v30 = vadd.s32 256, %v134_v28  ;;  %v137_v31 = vadd.s32 384, %v134_v28 }
  0xc2   :  { %v144_v35 = vpop.permute.xlu0 %143 }
  0xc3   :  { %vm145_vm0 = vcmp.lt.s32.totalorder %v134_v28, %v144_v35  ;;  %vm146_vm1 = vcmp.lt.s32.totalorder %v135_v29, %v144_v35  ;;  %vm147_vm2 = vcmp.lt.s32.totalorder %v136_v30, %v144_v35  ;;  %vm148_vm3 = vcmp.lt.s32.totalorder %v137_v31, %v144_v35 }
  0xc4   :  { %v149_v37 = vsel %vm145_vm0, %v105_v13, 0.0  ;;  %v150_v38 = vsel %vm146_vm1, %v106_v14, 0.0  ;;  %v151_v39 = vsel %vm147_vm2, %v107_v15, 0.0  ;;  %v152_v40 = vsel %vm148_vm3, %v108_v16, 0.0 }
  0xc5   :  { %v153_v41 = vadd.f32 %v149_v37, %v138_v32  ;;  %v154_v42 = vadd.f32 %v150_v38, %v139_v33  ;;  %v155_v43 = vadd.f32 %v151_v39, %v140_v34  ;;  %v156_v44 = vadd.f32 %v152_v40, %v141_v36 }
  0xc7   :  { %157 = vst [vmem:[#allocation2 + $0x10] sm:$0xff] %v153_v41 }
  0xc8   :  { %158 = vst [vmem:[#allocation2] sm:$0xff] %v154_v42 }
  0xc9   :  { %159 = vst [vmem:[#allocation2 + $0x18] sm:$0xff] %v155_v43 }
  0xca   :  { %160 = vst [vmem:[#allocation2 + $0x8] sm:$0xff] %v156_v44 }
  0xcb PF:  { %vm169_vm4 = vcmask 1047556   ;;  %v452_v51 = vmov 1983009808   ;;  %v453_v60 = vmov 1934713408   ;;  %vm225_vm5 = vcmask 1043456  }
  0xcc   :  { %v174_v52 = vunpack.c.l.s4 %v452_v51  ;;  %v198_v61 = vunpack.c.l.s4 %v453_v60  ;;  %vm290_vm6 = vcmask 1041409   ;;  %vm292_vm7 = vcmask 1042434   ;;  %s454_s1 = smov [#allocation10]   ;;  %s313_s25 = sshll.u32 %s539_s4, 4  ;;  %s314_s25 = int_to_ptr.hbm [resolvable:$true] %s313_s25 }
  0xcd   :  { %vm294_vm8 = vcmask 1043459   ;;  %vm296_vm9 = vcmask 1044484   ;;  %vm298_vm10 = vcmask 1045509   ;;  %vm300_vm11 = vcmask 1046534   ;;  %s311_s23 = sshll.u32 %s454_s1, 4  ;;  %s312_s23 = int_to_ptr.vmem [resolvable:$true] %s311_s23 }
  0xce   :  { %v164_v45 = vld [vmem:[#allocation2 + $0x10] sm:$0xff]  ;;  %v175_v57 = vunpack.c.0.s8 %v174_v52  ;;  %v199_v2 = vunpack.c.0.s8 %v198_v61  ;;  %vm302_vm12 = vcmask 1047559  }
  0xcf   :  { %v165_v46 = vld [vmem:[#allocation2] sm:$0xff]  ;;  %v171_v50 = vrot.slane %v164_v45, 4 }
  0xd0   :  { %v166_v47 = vld [vmem:[#allocation2 + $0x18] sm:$0xff]  ;;  %v183_v53 = vrot.slane %v165_v46, 4 }
  0xd1   :  { %v167_v48 = vld [vmem:[#allocation2 + $0x8] sm:$0xff]  ;;  %v168_v49 = vrot.slane %v166_v47, 4  ;;  %v172_v56 = vsel %vm169_vm4, %v166_v47, %v171_v50 }
  0xd2   :  { %v181_v54 = vrot.slane %v167_v48, 4  ;;  %v184_v58 = vsel %vm169_vm4, %v167_v48, %v183_v53  ;;  %v180_v63 = vperm.slane %v172_v56, %v175_v57 }
  0xd3   :  { %v170_v55 = vsel %vm169_vm4, %v168_v49, %v164_v45  ;;  %v192_v1 = vperm.slane %v184_v58, %v175_v57 }
  0xd4   :  { %v182_v59 = vsel %vm169_vm4, %v181_v54, %v165_v46  ;;  %v176_v62 = vperm.slane %v170_v55, %v175_v57  ;;  %v207_v6 = vrot.slane %v180_v63, 4 }
  0xd5   :  { %v188_v0 = vperm.slane %v182_v59, %v175_v57  ;;  %v205_v5 = vrot.slane %v192_v1, 4 }
  0xd6   :  { %v195_v4 = vrot.slane %v176_v62, 4  ;;  %v208_v10 = vsel %vm169_vm4, %v192_v1, %v207_v6 }
  0xd7   :  { %v193_v3 = vrot.slane %v188_v0, 4  ;;  %v206_v9 = vsel %vm169_vm4, %v205_v5, %v180_v63  ;;  %v216_v14 = vperm.slane %v208_v10, %v199_v2 }
  0xd8   :  { %v196_v8 = vsel %vm169_vm4, %v188_v0, %v195_v4  ;;  %v212_v13 = vperm.slane %v206_v9, %v199_v2 }
  0xd9   :  { %v194_v7 = vsel %vm169_vm4, %v193_v3, %v176_v62  ;;  %v204_v12 = vperm.slane %v196_v8, %v199_v2  ;;  %v223_v18 = vrot.slane %v216_v14, 4  ;;  %v268_v22 = vsel %vm225_vm5, %v216_v14, 0.0 }
  0xda   :  { %v200_v11 = vperm.slane %v194_v7, %v199_v2  ;;  %v221_v17 = vrot.slane %v212_v13, 4  ;;  %v254_v21 = vsel %vm225_vm5, %v212_v13, 0.0  ;;  %v269_v38 = vrot.slane %v268_v22, 4 }
  0xdb   :  { %v219_v16 = vrot.slane %v204_v12, 4  ;;  %v240_v20 = vsel %vm225_vm5, %v204_v12, 0.0  ;;  %v224_v26 = vsel %vm169_vm4, 0.0, %v223_v18  ;;  %v255_v33 = vrot.slane %v254_v21, 4 }
  0xdc   :  { %v217_v15 = vrot.slane %v200_v11, 4  ;;  %v226_v19 = vsel %vm225_vm5, %v200_v11, 0.0  ;;  %v222_v25 = vsel %vm169_vm4, 0.0, %v221_v17  ;;  %v241_v29 = vrot.slane %v240_v20, 4 }
  0xdd   :  { %v220_v24 = vsel %vm169_vm4, 0.0, %v219_v16  ;;  %v227_v27 = vrot.slane %v226_v19, 4  ;;  %v261_v34 = vsel %vm225_vm5, %v222_v25, 0.0  ;;  %v256_v41 = vadd.f32 %v255_v33, %v254_v21 }
  0xde   :  { %v218_v23 = vsel %vm169_vm4, 0.0, %v217_v15  ;;  %v247_v30 = vsel %vm225_vm5, %v220_v24, 0.0  ;;  %v242_v36 = vadd.f32 %v241_v29, %v240_v20  ;;  %v262_v37 = vrot.slane %v261_v34, 4 }
  0xdf   :  { %v233_v28 = vsel %vm225_vm5, %v218_v23, 0.0  ;;  %v248_v32 = vrot.slane %v247_v30, 4  ;;  %v228_v35 = vadd.f32 %v227_v27, %v226_v19  ;;  %v275_v42 = vsel %vm225_vm5, %v224_v26, 0.0 }
  0xe0   :  { %v234_v31 = vrot.slane %v233_v28, 4  ;;  %v243_v44 = vrot.slane %v242_v36, 2  ;;  %v263_v45 = vadd.f32 %v262_v37, %v261_v34  ;;  %v270_v46 = vadd.f32 %v269_v38, %v268_v22 }
  0xe1   :  { %v249_v40 = vadd.f32 %v248_v32, %v247_v30  ;;  %v229_v43 = vrot.slane %v228_v35, 2  ;;  %v257_v49 = vrot.slane %v256_v41, 2  ;;  %v276_v50 = vrot.slane %v275_v42, 4 }
  0xe2   :  { %v235_v39 = vadd.f32 %v234_v31, %v233_v28  ;;  %v244_v52 = vadd.f32 %v243_v44, %v242_v36  ;;  %v264_v53 = vrot.slane %v263_v45, 2  ;;  %v271_v54 = vrot.slane %v270_v46, 2 }
  0xe3   :  { %v250_v48 = vrot.slane %v249_v40, 2  ;;  %v230_v51 = vadd.f32 %v229_v43, %v228_v35  ;;  %v258_v57 = vadd.f32 %v257_v49, %v256_v41  ;;  %v277_v58 = vadd.f32 %v276_v50, %v275_v42 }
  0xe4   :  { %v236_v47 = vrot.slane %v235_v39, 2  ;;  %v245_v60 = vrot.slane %v244_v52, 1  ;;  %v265_v61 = vadd.f32 %v264_v53, %v263_v45  ;;  %v272_v62 = vadd.f32 %v271_v54, %v270_v46 }
  0xe5   :  { %v251_v56 = vadd.f32 %v250_v48, %v249_v40  ;;  %v231_v59 = vrot.slane %v230_v51, 1  ;;  %v259_v1 = vrot.slane %v258_v57, 1  ;;  %v278_v2 = vrot.slane %v277_v58, 2 }
  0xe6   :  { %v237_v55 = vadd.f32 %v236_v47, %v235_v39  ;;  %v246_v4 = vadd.f32 %v245_v60, %v244_v52  ;;  %v266_v5 = vrot.slane %v265_v61, 1  ;;  %v273_v6 = vrot.slane %v272_v62, 1 }
  0xe7   :  { %v252_v0 = vrot.slane %v251_v56, 1  ;;  %v232_v3 = vadd.f32 %v231_v59, %v230_v51  ;;  %v279_v9 = vadd.f32 %v278_v2, %v277_v58  ;;  %v260_v10 = vadd.f32 %v259_v1, %v258_v57 }
  0xe8   :  { %v238_v63 = vrot.slane %v237_v55, 1  ;;  %v267_v11 = vadd.f32 %v266_v5, %v265_v61  ;;  %v274_v14 = vadd.f32 %v273_v6, %v272_v62 }
  0xe9   :  { %v253_v8 = vadd.f32 %v252_v0, %v251_v56  ;;  %v280_v12 = vrot.slane %v279_v9, 1 }
  0xea   :  { %v239_v7 = vadd.f32 %v238_v63, %v237_v55 }
  0xeb   :  { %v281_v16 = vadd.f32 %v280_v12, %v279_v9 }
  0xec   :  { %v291_v13 = vsel %vm290_vm6, %v239_v7, %v232_v3 }
  0xed   :  { %v293_v15 = vsel %vm292_vm7, %v246_v4, %v291_v13 }
  0xee   :  { %v295_v17 = vsel %vm294_vm8, %v253_v8, %v293_v15 }
  0xef   :  { %v297_v18 = vsel %vm296_vm9, %v260_v10, %v295_v17 }
  0xf0   :  { %v299_v19 = vsel %vm298_vm10, %v267_v11, %v297_v18 }
  0xf1   :  { %v301_v20 = vsel %vm300_vm11, %v274_v14, %v299_v19 }
  0xf2   :  { %v303_v21 = vsel %vm302_vm12, %v281_v16, %v301_v20 }
  0xf3   :  { %305 = vst [vmem:[#allocation10] sm:$0xff] %v303_v21 }
  0xf4   :  { %316 = dma.vmem_to_hbm [thread:$0]  %s312_s23, 128, %s314_s25, [#allocation7]  }
  0xf5   :  { %445 = dma.done.wait [#allocation7], 128  }
  0xf6   :  { %446 = vsyncadd [#allocation7], 4294967168 }
  0xf7   :  { %321 = vsyncpa [#allocation6], 1 }
  0xf8   :  { %322 = vsyncpa [#allocation9], 1 }
  0xf9   :  { %323 = vsyncpa [#allocation7], 1 }

</bundles_post_ra>
